<compile_context>
chip_gen: v6e
topology: v6e:2x2x1
jax: 0.10.0
libtpu: 0.0.40
codegen_flags: <defaults>
</compile_context>

<pallas_src>
import jax
import jax.numpy as jnp
from jax.experimental import pallas as pl
from jax.experimental.pallas import tpu as pltpu


def mlp_kernel(x_ref, w1_ref, b1_ref, w2_ref, b2_ref, w3_ref, b3_ref, o_ref):
    """Fused 3x (Linear -> ReLU) on the current batch tile.

    x arrives as f32 straight from HBM and is cast to bf16 on the VPU (free in
    this memory-bound regime); each matmul accumulates in f32 on the MXU;
    bias-add + ReLU run in f32; activations are re-cast to bf16 only to feed
    the next matmul; the final store uses o_ref.dtype (bf16 by default).
    """
    x = x_ref[...].astype(jnp.bfloat16)

    h1 = jnp.dot(x, w1_ref[...], preferred_element_type=jnp.float32) + b1_ref[...]
    h1 = jnp.maximum(h1, 0.0).astype(jnp.bfloat16)

    h2 = jnp.dot(h1, w2_ref[...], preferred_element_type=jnp.float32) + b2_ref[...]
    h2 = jnp.maximum(h2, 0.0).astype(jnp.bfloat16)

    h3 = jnp.dot(h2, w3_ref[...], preferred_element_type=jnp.float32) + b3_ref[...]
    h3 = jnp.maximum(h3, 0.0)

    # Note: for tiles >> 4K rows one could sub-chunk this body with a
    # lax.fori_loop(unroll=True) to bound f32 intermediate pressure; at the
    # 4096-row cap Mosaic's internal matmul tiling handles it fine.
    o_ref[...] = h3.astype(o_ref.dtype)


def _round_up(n, m):
    return ((n + m - 1) // m) * m


def _choose_batch_tile(B):
    """Largest 256-aligned tile <= 4096 that still yields >= 2 grid steps.

    Big tiles amortize the ~0.35us per-grid-step cost and keep DMA streams
    long; the 4096-row cap keeps per-step VMEM (~2.2 KiB/row with
    double-buffered x/out plus f32 intermediates) around 9 MiB -- comfortably
    inside the 32 MiB limit we request on every generation (v7x has only
    64 MiB physical VMEM).  >= 2 steps lets dimension_semantics=("parallel",)
    feed both v7x TensorCores.  256 is a multiple of the MXU row count on
    v6e/v7x (2x256) and v5e (4x128).
    """
    tile = _round_up(pl.cdiv(B, 2), 256)
    return max(256, min(4096, tile))


def prepare_params(params):
    """One-time parameter prep -- do NOT redo this per forward call.

    * weights -> bf16 (MXU operands), biases -> f32 (f32 epilogue)
    * w3/b3 lane-padded so the output dim is a multiple of 128
      (unmasked full-lane vst on the dominant store path).
    Weights are stored as (in, out) == PyTorch weight.T.
    """
    d_out = params["w3"].shape[1]
    d_out_p = _round_up(d_out, 128)
    w3, b3 = params["w3"], params["b3"]
    if d_out_p != d_out:
        w3 = jnp.pad(w3, ((0, 0), (0, d_out_p - d_out)))
        b3 = jnp.pad(b3, ((0, 0), (0, d_out_p - d_out)))
    return {
        "w1": params["w1"].astype(jnp.bfloat16),
        "b1": params["b1"].astype(jnp.float32),
        "w2": params["w2"].astype(jnp.bfloat16),
        "b2": params["b2"].astype(jnp.float32),
        "w3": w3.astype(jnp.bfloat16),
        "b3": b3.astype(jnp.float32),
    }


def mlp_forward(x, params, *, embedding_dim, batch_tile=None, out_dtype=jnp.bfloat16):
    """x: (B, input_dim) float32.  params: output of prepare_params().

    Returns (B, embedding_dim) in out_dtype (bf16 by default to halve the
    output HBM stream; pass out_dtype=jnp.float32 for exact PyTorch dtype).
    Call this under jax.jit (embedding_dim/batch_tile/out_dtype static) so the
    trailing lane-slice fuses with the consumer.
    """
    w1, b1 = params["w1"], params["b1"]
    w2, b2 = params["w2"], params["b2"]
    w3, b3 = params["w3"], params["b3"]

    B, d_in = x.shape
    d_h1 = w1.shape[1]
    d_h2 = w2.shape[1]
    d_out_p = w3.shape[1]  # lane-padded (multiple of 128)

    if batch_tile is None:
        batch_tile = _choose_batch_tile(B)

    grid = (pl.cdiv(B, batch_tile),)  # ragged last tile: OOB writes are masked

    resident = lambda shape: pl.BlockSpec(shape, lambda i: (0, 0))

    flops = 2 * B * (d_in * d_h1 + d_h1 * d_h2 + d_h2 * d_out_p)
    bytes_accessed = (
        x.size * x.dtype.itemsize
        + (w1.size + w2.size + w3.size) * 2
        + (b1.size + b2.size + b3.size) * 4
        + B * d_out_p * jnp.dtype(out_dtype).itemsize
    )

    out = pl.pallas_call(
        mlp_kernel,
        out_shape=jax.ShapeDtypeStruct((B, d_out_p), out_dtype),
        grid_spec=pltpu.PrefetchScalarGridSpec(
            num_scalar_prefetch=0,
            grid=grid,
            in_specs=[
                pl.BlockSpec((batch_tile, d_in), lambda i: (i, 0)),  # x tile (f32)
                resident((d_in, d_h1)),     # w1 (VMEM-resident across grid)
                resident((1, d_h1)),        # b1
                resident((d_h1, d_h2)),     # w2
                resident((1, d_h2)),        # b2
                resident((d_h2, d_out_p)),  # w3 (lane-padded)
                resident((1, d_out_p)),     # b3 (lane-padded)
            ],
            out_specs=pl.BlockSpec((batch_tile, d_out_p), lambda i: (i, 0)),
        ),
        compiler_params=pltpu.CompilerParams(
            dimension_semantics=("parallel",),   # batch tiles across v7x TCs
            vmem_limit_bytes=32 * 1024 * 1024,   # > v5e's 16 MiB scoped default
        ),
        cost_estimate=pl.CostEstimate(
            flops=flops, transcendentals=0, bytes_accessed=bytes_accessed
        ),
    )(x, w1, b1, w2, b2, w3, b3)

    # Strip only the lane padding; under jit this fuses into the consumer.
    # (Rows >= B never exist: out_shape has exactly B rows.)
    return out[:, :embedding_dim]


def init_params(key, input_dim, hidden_dim1, hidden_dim2, embedding_dim):
    """Deterministic synthetic init (Kaiming-uniform-like scale)."""
    ks = jax.random.split(key, 6)

    def linear(kw, kb, fan_in, fan_out):
        bound = 1.0 / jnp.sqrt(fan_in)
        # stored as (in, out) == PyTorch weight.T
        w = jax.random.uniform(kw, (fan_in, fan_out), jnp.float32, -bound, bound)
        b = jax.random.uniform(kb, (1, fan_out), jnp.float32, -bound, bound)
        return w, b

    w1, b1 = linear(ks[0], ks[1], input_dim, hidden_dim1)
    w2, b2 = linear(ks[2], ks[3], hidden_dim1, hidden_dim2)
    w3, b3 = linear(ks[4], ks[5], hidden_dim2, embedding_dim)
    return {"w1": w1, "b1": b1, "w2": w2, "b2": b2, "w3": w3, "b3": b3}


def mlp_reference(x, p):
    """jnp reference mirroring the kernel's bf16-operand / f32-accumulate path."""
    bf = jnp.bfloat16

    def layer(h, w, b):
        y = jnp.dot(h.astype(bf), w.astype(bf), preferred_element_type=jnp.float32)
        return jnp.maximum(y + b, 0.0)

    h = layer(x, p["w1"], p["b1"])
    h = layer(h, p["w2"], p["b2"])
    h = layer(h, p["w3"], p["b3"])
    return h


if __name__ == "__main__":
    # hparams: input_dim=32, hidden_dim1=128, hidden_dim2=128, embedding_dim=64
    input_dim, hidden_dim1, hidden_dim2, embedding_dim = 32, 128, 128, 64
    batch = 300  # not a tile multiple -> exercises the ragged-last-tile path

    key = jax.random.PRNGKey(0)
    k_x, k_p = jax.random.split(key)
    x = jax.random.normal(k_x, (batch, input_dim), jnp.float32)
    raw_params = init_params(k_p, input_dim, hidden_dim1, hidden_dim2, embedding_dim)

    # One-time parameter prep (bf16 weights, f32 biases, lane-padded layer 3).
    params = prepare_params(raw_params)

    fwd = jax.jit(
        mlp_forward, static_argnames=("embedding_dim", "batch_tile", "out_dtype")
    )
    out = fwd(x, params, embedding_dim=embedding_dim)
    out = jax.block_until_ready(out)

    ref = mlp_reference(x, raw_params)
    assert out.shape == (batch, embedding_dim), out.shape
    assert out.dtype == jnp.bfloat16, out.dtype
    max_err = float(jnp.max(jnp.abs(out.astype(jnp.float32) - ref)))
    # bf16 output rounding (~0.4% rel) on O(1) activations.
    assert max_err < 3e-2, f"mismatch vs reference (max err {max_err})"

    print("KERNEL_OK")
</pallas_src>

<mosaic_0001>
module attributes {stable_mosaic.version = 11 : i64} {
  func.func @mlp_kernel(%arg0: i32, %arg1: memref<256x32xf32, #tpu.memory_space<vmem>>, %arg2: memref<32x128xbf16, #tpu.memory_space<vmem>>, %arg3: memref<1x128xf32, #tpu.memory_space<vmem>>, %arg4: memref<128x128xbf16, #tpu.memory_space<vmem>>, %arg5: memref<1x128xf32, #tpu.memory_space<vmem>>, %arg6: memref<128x128xbf16, #tpu.memory_space<vmem>>, %arg7: memref<1x128xf32, #tpu.memory_space<vmem>>, %arg8: memref<256x128xbf16, #tpu.memory_space<vmem>>) attributes {dimension_semantics = [#tpu.dimension_semantics<parallel>], iteration_bounds = array<i64: 2>, scalar_prefetch = 0 : i64, scratch_operands = 0 : i64, tpu.core_type = #tpu.core_type<tc>, window_params = [{transform_indices = @transform_0, window_bounds = array<i64: 256, 32>}, {pipeline_mode = #tpu.pipeline_mode<synchronous>, transform_indices = @transform_1, window_bounds = array<i64: 32, 128>}, {pipeline_mode = #tpu.pipeline_mode<synchronous>, transform_indices = @transform_2, window_bounds = array<i64: 1, 128>}, {pipeline_mode = #tpu.pipeline_mode<synchronous>, transform_indices = @transform_3, window_bounds = array<i64: 128, 128>}, {pipeline_mode = #tpu.pipeline_mode<synchronous>, transform_indices = @transform_4, window_bounds = array<i64: 1, 128>}, {pipeline_mode = #tpu.pipeline_mode<synchronous>, transform_indices = @transform_5, window_bounds = array<i64: 128, 128>}, {pipeline_mode = #tpu.pipeline_mode<synchronous>, transform_indices = @transform_6, window_bounds = array<i64: 1, 128>}, {transform_indices = @transform_7, window_bounds = array<i64: 256, 128>}]} {
    %c0 = arith.constant 0 : index
    %c0_0 = arith.constant 0 : index
    %0 = vector.load %arg1[%c0, %c0_0] : memref<256x32xf32, #tpu.memory_space<vmem>>, vector<256x32xf32>
    %1 = arith.truncf %0 : vector<256x32xf32> to vector<256x32xbf16>
    %c0_1 = arith.constant 0 : index
    %c0_2 = arith.constant 0 : index
    %2 = vector.load %arg2[%c0_1, %c0_2] : memref<32x128xbf16, #tpu.memory_space<vmem>>, vector<32x128xbf16>
    %cst = arith.constant dense<0.000000e+00> : vector<256x128xf32>
    %3 = tpu.matmul %1, %2, %cst {dimension_numbers = #tpu.dot_dimension_numbers<[1], [0], [0], [1], [0, 0, 1, 1], [], []>} : vector<256x32xbf16>, vector<32x128xbf16>, vector<256x128xf32> -> vector<256x128xf32>
    %c0_3 = arith.constant 0 : index
    %c0_4 = arith.constant 0 : index
    %4 = vector.load %arg3[%c0_3, %c0_4] : memref<1x128xf32, #tpu.memory_space<vmem>>, vector<1x128xf32>
    %5 = vector.broadcast %4 : vector<1x128xf32> to vector<256x128xf32>
    %6 = arith.addf %3, %5 : vector<256x128xf32>
    %cst_5 = arith.constant 0.000000e+00 : f32
    %7 = vector.broadcast %cst_5 : f32 to vector<256x128xf32>
    %8 = arith.maximumf %6, %7 : vector<256x128xf32>
    %9 = arith.truncf %8 : vector<256x128xf32> to vector<256x128xbf16>
    %c0_6 = arith.constant 0 : index
    %c0_7 = arith.constant 0 : index
    %10 = vector.load %arg4[%c0_6, %c0_7] : memref<128x128xbf16, #tpu.memory_space<vmem>>, vector<128x128xbf16>
    %cst_8 = arith.constant dense<0.000000e+00> : vector<256x128xf32>
    %11 = tpu.matmul %9, %10, %cst_8 {dimension_numbers = #tpu.dot_dimension_numbers<[1], [0], [0], [1], [0, 0, 1, 1], [], []>} : vector<256x128xbf16>, vector<128x128xbf16>, vector<256x128xf32> -> vector<256x128xf32>
    %c0_9 = arith.constant 0 : index
    %c0_10 = arith.constant 0 : index
    %12 = vector.load %arg5[%c0_9, %c0_10] : memref<1x128xf32, #tpu.memory_space<vmem>>, vector<1x128xf32>
    %13 = vector.broadcast %12 : vector<1x128xf32> to vector<256x128xf32>
    %14 = arith.addf %11, %13 : vector<256x128xf32>
    %cst_11 = arith.constant 0.000000e+00 : f32
    %15 = vector.broadcast %cst_11 : f32 to vector<256x128xf32>
    %16 = arith.maximumf %14, %15 : vector<256x128xf32>
    %17 = arith.truncf %16 : vector<256x128xf32> to vector<256x128xbf16>
    %c0_12 = arith.constant 0 : index
    %c0_13 = arith.constant 0 : index
    %18 = vector.load %arg6[%c0_12, %c0_13] : memref<128x128xbf16, #tpu.memory_space<vmem>>, vector<128x128xbf16>
    %cst_14 = arith.constant dense<0.000000e+00> : vector<256x128xf32>
    %19 = tpu.matmul %17, %18, %cst_14 {dimension_numbers = #tpu.dot_dimension_numbers<[1], [0], [0], [1], [0, 0, 1, 1], [], []>} : vector<256x128xbf16>, vector<128x128xbf16>, vector<256x128xf32> -> vector<256x128xf32>
    %c0_15 = arith.constant 0 : index
    %c0_16 = arith.constant 0 : index
    %20 = vector.load %arg7[%c0_15, %c0_16] : memref<1x128xf32, #tpu.memory_space<vmem>>, vector<1x128xf32>
    %21 = vector.broadcast %20 : vector<1x128xf32> to vector<256x128xf32>
    %22 = arith.addf %19, %21 : vector<256x128xf32>
    %cst_17 = arith.constant 0.000000e+00 : f32
    %23 = vector.broadcast %cst_17 : f32 to vector<256x128xf32>
    %24 = arith.maximumf %22, %23 : vector<256x128xf32>
    %25 = arith.truncf %24 : vector<256x128xf32> to vector<256x128xbf16>
    %c0_18 = arith.constant 0 : index
    %c0_19 = arith.constant 0 : index
    %26 = vector.load %arg8[%c0_18, %c0_19] : memref<256x128xbf16, #tpu.memory_space<vmem>>, vector<256x128xbf16>
    tpu.vector_store %arg8[%c0_18, %c0_19], %25 {strides = array<i32>} : memref<256x128xbf16, #tpu.memory_space<vmem>>, vector<256x128xbf16>,
    return
  }
  func.func @transform_0(%arg0: i32) -> (i32, i32) {
    %c0_i32 = arith.constant 0 : i32
    %c0_i32_0 = arith.constant 0 : i32
    return %arg0, %c0_i32 : i32, i32
  }
  func.func @transform_1(%arg0: i32) -> (i32, i32) {
    %c0_i32 = arith.constant 0 : i32
    %c0_i32_0 = arith.constant 0 : i32
    %c0_i32_1 = arith.constant 0 : i32
    return %c0_i32, %c0_i32_0 : i32, i32
  }
  func.func @transform_2(%arg0: i32) -> (i32, i32) {
    %c0_i32 = arith.constant 0 : i32
    %c0_i32_0 = arith.constant 0 : i32
    %c0_i32_1 = arith.constant 0 : i32
    return %c0_i32, %c0_i32_0 : i32, i32
  }
  func.func @transform_3(%arg0: i32) -> (i32, i32) {
    %c0_i32 = arith.constant 0 : i32
    %c0_i32_0 = arith.constant 0 : i32
    %c0_i32_1 = arith.constant 0 : i32
    return %c0_i32, %c0_i32_0 : i32, i32
  }
  func.func @transform_4(%arg0: i32) -> (i32, i32) {
    %c0_i32 = arith.constant 0 : i32
    %c0_i32_0 = arith.constant 0 : i32
    %c0_i32_1 = arith.constant 0 : i32
    return %c0_i32, %c0_i32_0 : i32, i32
  }
  func.func @transform_5(%arg0: i32) -> (i32, i32) {
    %c0_i32 = arith.constant 0 : i32
    %c0_i32_0 = arith.constant 0 : i32
    %c0_i32_1 = arith.constant 0 : i32
    return %c0_i32, %c0_i32_0 : i32, i32
  }
  func.func @transform_6(%arg0: i32) -> (i32, i32) {
    %c0_i32 = arith.constant 0 : i32
    %c0_i32_0 = arith.constant 0 : i32
    %c0_i32_1 = arith.constant 0 : i32
    return %c0_i32, %c0_i32_0 : i32, i32
  }
  func.func @transform_7(%arg0: i32) -> (i32, i32) {
    %c0_i32 = arith.constant 0 : i32
    %c0_i32_0 = arith.constant 0 : i32
    return %arg0, %c0_i32 : i32, i32
  }
}

</mosaic_0001>

<bundles_post_ra>
// kernel: mlp_forward.1
= control target key start
LH: loop header
LB: loop body
LE: loop exit
PB: predicated region body
PF: predicated region fallthrough
CT: control target
= control target key end

     0   :  { %s2333_s24 = smov 0   ;;  %s2335_s25 = smov 0   ;;  %s2754_s0 = inlined_call_operand.vmem [shape: f32[300,32], index: 0, kind: input, shape index: {}]   ;;  %s2755_s1 = inlined_call_operand.vmem [shape: bf16[32,128], index: 1, kind: input, shape index: {}]   ;;  %s2756_s2 = inlined_call_operand.vmem [shape: f32[1,128], index: 2, kind: input, shape index: {}]   ;;  %s2757_s3 = inlined_call_operand.vmem [shape: bf16[128,128], index: 3, kind: input, shape index: {}]   ;;  %s2758_s4 = inlined_call_operand.vmem [shape: f32[1,128], index: 4, kind: input, shape index: {}]   ;;  %s2759_s5 = inlined_call_operand.vmem [shape: bf16[128,128], index: 5, kind: input, shape index: {}]   ;;  %s2760_s6 = inlined_call_operand.vmem [shape: f32[1,128], index: 6, kind: input, shape index: {}]   ;;  %s2761_s7 = inlined_call_operand.vmem [shape: bf16[300,128], index: 7, kind: output, shape index: {}]  }
   0x1   :  { %s2337_s26 = smov 0  }
   0x2 LB: > { %s2346_s27 = sadd.s32 4294967295, %s2259_s26   ;;  %s2348_s28 = sadd.s32 1, %s2259_s26   ;;  %s2259_s26 = sphi %s2337_s26, %s2768_s26   ;;  %s2255_s25 = sphi %s2335_s25, %s2767_s25   ;;  %s2251_s24 = sphi %s2333_s24, %s2766_s24  }
   0x3   : > { %s173_s29 = ssub.s32 %s2259_s26, %s2348_s28  ;;  %s176_s30 = sadd.s32 1, %s2255_s25 }
   0x4   : > { %p174_p0 = scmp.eq.s32.totalorder %s173_s29, 0  ;;  %p186_p1 = scmp.ne.s32.totalorder %s2255_s25, %s2251_s24 }
   0x5   : > { %p187_p2 = scmp.eq.s32.totalorder %s2346_s27, 1  ;;  %p1677_p3 = scmp.ge.s32.totalorder %s2259_s26, 1 }
   0x6   : > { %s2356_s8 = scalar_select %p174_p0, %s2255_s25, %s176_s30  }
   0x7   : > { %p2358_p4 = por %p187_p2, %p186_p1  ;;  %p246_p5 = scmp.lt.s32.totalorder %s2259_s26, 3 }
   0x9   : > { %p247_p6 = pnand %p1677_p3, %p246_p5 }
   0xa   : > { %s2366_s12 = sshll.u32 (!%p247_p6), %s2346_s27, 5  ;;  %s278_s30 = sand.u32 (!%p247_p6), 1, %s2251_s24  }
   0xb   : > { %250 = sbr.rel (%p247_p6) target bundleno = 759 (0x2f7), region = 48  ;;  %p286_p7 = scmp.lt.s32.totalorder (!%p247_p6), %s2366_s12, 37 }
   0xc   : > { %s1678_s10 = sshll.u32 (!%p247_p6), %s278_s30, 7 }
   0xd   : > { %s2573_s11 = scalar_lea.vmem (!%p247_p6), [#allocation2], %s1678_s10  }
  0x10   : > { %v2187_v0 = vld [vmem:[%s2755_s1 + $0x8] sm:$0xff]   ;;  %v2188_v1 = vld [vmem:[%s2755_s1] sm:$0xff]   ;;  %s287_s15 = scalar_select %p286_p7, %s2366_s12, 37  ;;  %v2189_v2 = vld [vmem:[%s2757_s3 + $0x38] sm:$0xff]   ;;  %vm372_vm0 = vcmask 261120  }
  0x11   : > { %1963 = vmatprep.subr.bf16.mxu0 %v2187_v0  ;;  %2095 = vmatprep.subr.bf16.mxu1 %v2187_v0  ;;  %v2190_v24 = vld [vmem:[%s2757_s3 + $0x30] sm:$0xff]   ;;  %v2191_v30 = vld [vmem:[%s2757_s3 + $0x28] sm:$0xff]   ;;  %v2192_v38 = vld [vmem:[%s2757_s3 + $0x20] sm:$0xff]   ;;  %s1342_s24 = ssub.s32 (%p2358_p4), 38, %s2366_s12  ;;  %s1799_s13 = sshll.u32 (%p2358_p4), %s2346_s27, 7 }
  0x12   : > { %1964 = vmatpush3.bf16.msra.mxu0 %v2187_v0  ;;  %2097 = vmatpush3.bf16.msra.mxu1 %v2187_v0  ;;  %s1680_s18 = sshll.u32 %s287_s15, 3  ;;  %v2193_v46 = vld [vmem:[%s2757_s3 + $0x18] sm:$0xff]   ;;  %v2194_v55 = vld [vmem:[%s2757_s3 + $0x10] sm:$0xff]   ;;  %v2195_v56 = vld [vmem:[%s2757_s3 + $0x8] sm:$0xff]   ;;  %p1343_p8 = scmp.lt.s32.totalorder (%p2358_p4), %s1342_s24, 32 }
  0x13   : > { %1965 = vmatprep.subr.bf16.mxu0 %v2188_v1  ;;  %2096 = vmatprep.subr.bf16.mxu1 %v2188_v1  ;;  %s2379_s21 = scalar_lea.vmem %s2754_s0, %s1680_s18  ;;  %v2196_v57 = vld [vmem:[%s2757_s3] sm:$0xff]   ;;  %v2197_v58 = vld [vmem:[%s2759_s5 + $0x38] sm:$0xff]   ;;  %v2198_v59 = vld [vmem:[%s2759_s5 + $0x30] sm:$0xff]   ;;  %s2626_s16 = scalar_lea.vmem (%p2358_p4), %s2761_s7, %s1799_s13  }
  0x14   : > { %v301_v3 = vld [vmem:[%s2379_s21] sm:$0xff]  ;;  %v302_v4 = vld [vmem:[%s2379_s21 + $0x8] sm:$0xff]  ;;  %v303_v5 = vld [vmem:[%s2379_s21 + $0x10] sm:$0xff] }
  0x15   : > { %v333_v6 = vpack.c.bf16 %v302_v4, %v301_v3  ;;  %v304_v7 = vld [vmem:[%s2379_s21 + $0x18] sm:$0xff]  ;;  %v305_v8 = vld [vmem:[%s2379_s21 + $0x20] sm:$0xff]  ;;  %v306_v9 = vld [vmem:[%s2379_s21 + $0x28] sm:$0xff] }
  0x16   : > { %1966 = vmatpush3.bf16.msra.mxu0 %v2188_v1  ;;  %2098 = vmatpush3.bf16.msra.mxu1 %v2188_v1  ;;  %v334_v10 = vpack.c.bf16 %v304_v7, %v303_v5  ;;  %v335_v11 = vpack.c.bf16 %v306_v9, %v305_v8  ;;  %v307_v12 = vld [vmem:[%s2379_s21 + $0x30] sm:$0xff]  ;;  %v308_v13 = vld [vmem:[%s2379_s21 + $0x38] sm:$0xff]  ;;  %v309_v14 = vld [vmem:[%s2379_s21 + $0x40] sm:$0xff] }
  0x17   : > { %1999 = vmatprep.subr.bf16.mxu1 %v2189_v2  ;;  %1967 = vmatprep.mubr.msk.bf16.mxu0 %vm372_vm0, %v333_v6  ;;  %v310_v15 = vld [vmem:[%s2379_s21 + $0x48] sm:$0xff]  ;;  %v317_v16 = vld [vmem:[%s2379_s21 + $0x80] sm:$0xff]  ;;  %v319_v19 = vld [vmem:[%s2379_s21 + $0x90] sm:$0xff]  ;;  %v336_v25 = vpack.c.bf16 %v308_v13, %v307_v12 }
  0x18   : > { %v318_v17 = vld [vmem:[%s2379_s21 + $0x88] sm:$0xff]  ;;  %v320_v20 = vld [vmem:[%s2379_s21 + $0x98] sm:$0xff]  ;;  %v321_v21 = vld [vmem:[%s2379_s21 + $0xa0] sm:$0xff]  ;;  %v337_v27 = vpack.c.bf16 %v310_v15, %v309_v14  ;;  %2047 = vmatprep.subr.bf16.mxu0 %v2197_v58 }
  0x19   : > { %1968 = vmatmul.mubr.msk.bf16.vlgmr.msra.gmra.mxu0 %vm372_vm0, %v334_v10  ;;  %v341_v18 = vpack.c.bf16 %v318_v17, %v317_v16  ;;  %v342_v22 = vpack.c.bf16 %v320_v20, %v319_v19  ;;  %v322_v23 = vld [vmem:[%s2379_s21 + $0xa8] sm:$0xff]  ;;  %v323_v28 = vld [vmem:[%s2379_s21 + $0xb0] sm:$0xff]  ;;  %v324_v29 = vld [vmem:[%s2379_s21 + $0xb8] sm:$0xff] }
  0x1a   : > { %1971 = vmatprep.mubr.msk.bf16.mxu0 %vm372_vm0, %v335_v11  ;;  %v343_v26 = vpack.c.bf16 %v322_v23, %v321_v21  ;;  %v325_v31 = vld [vmem:[%s2379_s21 + $0xc0] sm:$0xff]  ;;  %v326_v32 = vld [vmem:[%s2379_s21 + $0xc8] sm:$0xff]  ;;  %v311_v33 = vld [vmem:[%s2379_s21 + $0x50] sm:$0xff]  ;;  %v344_v37 = vpack.c.bf16 %v324_v29, %v323_v28  ;;  %2048 = vmatpush3.bf16.msra.mxu0 %v2197_v58 }
  0x1b   : > { %1983 = vmatprep.mubr.msk.bf16.mxu1 %vm372_vm0, %v341_v18  ;;  %v312_v34 = vld [vmem:[%s2379_s21 + $0x58] sm:$0xff]  ;;  %v313_v35 = vld [vmem:[%s2379_s21 + $0x60] sm:$0xff]  ;;  %v314_v36 = vld [vmem:[%s2379_s21 + $0x68] sm:$0xff]  ;;  %v345_v39 = vpack.c.bf16 %v326_v32, %v325_v31  ;;  %2049 = vmatprep.subr.bf16.mxu0 %v2198_v59 }
  0x1c   : > { %1984 = vmatmul.mubr.msk.bf16.vlgmr.msra.gmra.mxu1 %vm372_vm0, %v342_v22  ;;  %v338_v40 = vpack.c.bf16 %v312_v34, %v311_v33  ;;  %v339_v41 = vpack.c.bf16 %v314_v36, %v313_v35  ;;  %v327_v42 = vld [vmem:[%s2379_s21 + $0xd0] sm:$0xff]  ;;  %v328_v43 = vld [vmem:[%s2379_s21 + $0xd8] sm:$0xff]  ;;  %v329_v44 = vld [vmem:[%s2379_s21 + $0xe0] sm:$0xff] }
  0x1d   : > { %1987 = vmatprep.mubr.msk.bf16.mxu1 %vm372_vm0, %v343_v26  ;;  %2000 = vmatpush3.bf16.msra.mxu1 %v2189_v2  ;;  %v330_v45 = vld [vmem:[%s2379_s21 + $0xe8] sm:$0xff]  ;;  %v315_v47 = vld [vmem:[%s2379_s21 + $0x70] sm:$0xff]  ;;  %v316_v48 = vld [vmem:[%s2379_s21 + $0x78] sm:$0xff]  ;;  %v346_v49 = vpack.c.bf16 %v328_v43, %v327_v42 }
  0x1e   : > { %2001 = vmatprep.subr.bf16.mxu1 %v2190_v24  ;;  %v347_v50 = vpack.c.bf16 %v330_v45, %v329_v44  ;;  %v340_v51 = vpack.c.bf16 %v316_v48, %v315_v47  ;;  %v331_v52 = vld [vmem:[%s2379_s21 + $0xf0] sm:$0xff]  ;;  %v332_v53 = vld [vmem:[%s2379_s21 + $0xf8] sm:$0xff]  ;;  %v2199_v60 = vld [vmem:[%s2759_s5 + $0x28] sm:$0xff]   ;;  %2050 = vmatpush3.bf16.msra.mxu0 %v2198_v59 }
  0x1f   : > { %v348_v54 = vpack.c.bf16 %v332_v53, %v331_v52  ;;  %2051 = vmatprep.subr.bf16.mxu0 %v2199_v60  ;;  %v2200_v61 = vld [vmem:[%s2759_s5 + $0x20] sm:$0xff]   ;;  %v2201_v62 = vld [vmem:[%s2759_s5 + $0x18] sm:$0xff]  }
  0x20   : > { %v2468_v1 = vld [vmem:[%s2756_s2] ss:$0 sm:$0xff] }
  0x21   : > { %1972 = vmatmul.mubr.msk.bf16.gmra.mxu0 %vm372_vm0, %v336_v25  ;;  %2002 = vmatpush3.bf16.msra.mxu1 %v2190_v24 }
  0x22   : > { %1975 = vmatprep.mubr.msk.bf16.mxu0 %vm372_vm0, %v337_v27  ;;  %2003 = vmatprep.subr.bf16.mxu1 %v2191_v30 }
  0x23   : > { %2052 = vmatpush3.bf16.msra.mxu0 %v2199_v60 }
  0x24   : > { %1988 = vmatmul.mubr.msk.bf16.gmra.mxu1 %vm372_vm0, %v344_v37  ;;  %2053 = vmatprep.subr.bf16.mxu0 %v2200_v61 }
  0x25   : > { %1991 = vmatprep.mubr.msk.bf16.mxu1 %vm372_vm0, %v345_v39  ;;  %2004 = vmatpush3.bf16.msra.mxu1 %v2191_v30 }
  0x26   : > { %2005 = vmatprep.subr.bf16.mxu1 %v2192_v38 }
  0x27   : > { %2054 = vmatpush3.bf16.msra.mxu0 %v2200_v61 }
  0x28   : > { %2055 = vmatprep.subr.bf16.mxu0 %v2201_v62 }
  0x29   : > { %1976 = vmatmul.mubr.msk.bf16.gmra.mxu0 %vm372_vm0, %v338_v40  ;;  %2006 = vmatpush3.bf16.msra.mxu1 %v2192_v38 }
  0x2a   : > { %1979 = vmatprep.mubr.msk.bf16.mxu0 %vm372_vm0, %v339_v41  ;;  %2007 = vmatprep.subr.bf16.mxu1 %v2193_v46 }
  0x2b   : > { %2056 = vmatpush3.bf16.msra.mxu0 %v2201_v62 }
  0x2c   : > { %1992 = vmatmul.mubr.msk.bf16.gmra.mxu1 %vm372_vm0, %v346_v49 }
  0x2d   : > { %1995 = vmatprep.mubr.msk.bf16.mxu1 %vm372_vm0, %v347_v50  ;;  %2008 = vmatpush3.bf16.msra.mxu1 %v2193_v46 }
  0x2e   : > { %2009 = vmatprep.subr.bf16.mxu1 %v2194_v55 }
  0x31   : > { %1980 = vmatmul.mubr.msk.bf16.gmra.mxu0 %vm372_vm0, %v340_v51  ;;  %2010 = vmatpush3.bf16.msra.mxu1 %v2194_v55 }
  0x32   : > { %2011 = vmatprep.subr.bf16.mxu1 %v2195_v56 }
  0x34   : > { %1996 = vmatmul.mubr.msk.bf16.gmra.mxu1 %vm372_vm0, %v348_v54 }
  0x35   : > { %2012 = vmatpush3.bf16.msra.mxu1 %v2195_v56 }
  0x36   : > { %2013 = vmatprep.subr.bf16.mxu1 %v2196_v57 }
  0x39   : > { %2014 = vmatpush3.bf16.msra.mxu1 %v2196_v57 }
  0xd9   : > { %v1969_v63 = vpop.f32.mrf.mxu0 }
  0xda   : > { %v464_v6 = vadd.f32 %v1969_v63, %v2468_v1 }
  0xdb   : > { %v455_v0 = vpop.f32.mrf.mxu0 }
  0xdc   : > { %v456_v3 = vadd.f32 %v2468_v1, %v455_v0  ;;  %v2472_v5 = vpop.f32.mrf.mxu1  ;;  %v584_v15 = vmax.f32 %v464_v6, 0.0 }
  0xdd   : > { %v1970_v2 = vpop.f32.mrf.mxu0 }
  0xde   : > { %v467_v4 = vadd.f32 %v1970_v2, %v2468_v1  ;;  %v519_v9 = vpop.f32.mrf.mxu1  ;;  %v582_v12 = vmax.f32 %v456_v3, 0.0 }
  0xdf   : > { %v458_v7 = vpop.f32.mrf.mxu0  ;;  %v520_v53 = vadd.f32 %v2468_v1, %v519_v9 }
  0xe0   : > { %v459_v8 = vadd.f32 %v2468_v1, %v458_v7  ;;  %v585_v10 = vmax.f32 %v467_v4, 0.0  ;;  %v2476_v14 = vpop.f32.mrf.mxu1 }
  0xe1   : > { %v1973_v11 = vpop.f32.mrf.mxu0  ;;  %v598_v62 = vmax.f32 %v520_v53, 0.0  ;;  %v2529_v53 = vld [vmem:[%s2758_s4] ss:$0 sm:$0xff] }
  0xe2   : > { %v583_v13 = vmax.f32 %v459_v8, 0.0  ;;  %v522_v18 = vpop.f32.mrf.mxu1  ;;  %v615_v19 = vpack.c.bf16 %v585_v10, %v584_v15  ;;  %v480_v24 = vadd.f32 %v1973_v11, %v2468_v1  ;;  %v531_v15 = vadd.f32 %v2476_v14, %v2468_v1 }
  0xe3   : > { %v471_v16 = vpop.f32.mrf.mxu0  ;;  %v523_v54 = vadd.f32 %v2468_v1, %v522_v18 }
  0xe4   : > { %v614_v17 = vpack.c.bf16 %v583_v13, %v582_v12  ;;  %v472_v21 = vadd.f32 %v2468_v1, %v471_v16  ;;  %v2480_v23 = vpop.f32.mrf.mxu1  ;;  %v588_v33 = vmax.f32 %v480_v24, 0.0  ;;  %v528_v12 = vadd.f32 %v2472_v5, %v2468_v1 }
  0xe5   : > { %v1974_v20 = vpop.f32.mrf.mxu0  ;;  %v599_v0 = vmax.f32 %v523_v54, 0.0  ;;  %v544_v5 = vadd.f32 %v2480_v23, %v2468_v1 }
  0xe6   : > { %v483_v22 = vadd.f32 %v1974_v20, %v2468_v1  ;;  %2015 = vmatprep.mubr.bf16.mxu1 %v614_v17  ;;  %v535_v27 = vpop.f32.mrf.mxu1  ;;  %v586_v30 = vmax.f32 %v472_v21, 0.0  ;;  %v601_v20 = vmax.f32 %v531_v15, 0.0 }
  0xe7   : > { %v474_v25 = vpop.f32.mrf.mxu0  ;;  %2016 = vmatmul.mubr.bf16.vlgmr.msra.gmra.mxu1 %v615_v19  ;;  %v622_v9 = vpack.c.bf16 %v599_v0, %v598_v62  ;;  %v536_v10 = vadd.f32 %v2468_v1, %v535_v27  ;;  %v600_v19 = vmax.f32 %v528_v12, 0.0 }
  0xe8   : > { %v475_v26 = vadd.f32 %v2468_v1, %v474_v25  ;;  %v589_v28 = vmax.f32 %v483_v22, 0.0  ;;  %v2484_v32 = vpop.f32.mrf.mxu1 }
  0xe9   : > { %v1977_v29 = vpop.f32.mrf.mxu0  ;;  %v602_v17 = vmax.f32 %v536_v10, 0.0  ;;  %v547_v14 = vadd.f32 %v2484_v32, %v2468_v1 }
  0xea   : > { %v587_v31 = vmax.f32 %v475_v26, 0.0  ;;  %v538_v36 = vpop.f32.mrf.mxu1  ;;  %v617_v37 = vpack.c.bf16 %v589_v28, %v588_v33  ;;  %v496_v42 = vadd.f32 %v1977_v29, %v2468_v1  ;;  %v623_v26 = vpack.c.bf16 %v601_v20, %v600_v19 }
  0xeb   : > { %v487_v34 = vpop.f32.mrf.mxu0  ;;  %v539_v11 = vadd.f32 %v2468_v1, %v538_v36 }
  0xec   : > { %v616_v35 = vpack.c.bf16 %v587_v31, %v586_v30  ;;  %v488_v39 = vadd.f32 %v2468_v1, %v487_v34  ;;  %v2488_v41 = vpop.f32.mrf.mxu1  ;;  %v592_v50 = vmax.f32 %v496_v42, 0.0  ;;  %v604_v30 = vmax.f32 %v544_v5, 0.0 }
  0xed   : > { %v1978_v38 = vpop.f32.mrf.mxu0  ;;  %v603_v18 = vmax.f32 %v539_v11, 0.0  ;;  %v605_v31 = vmax.f32 %v547_v14, 0.0  ;;  %v560_v23 = vadd.f32 %v2488_v41, %v2468_v1  ;;  %v2202_v41 = vld [vmem:[%s2759_s5 + $0x10] sm:$0xff]  }
  0xee   : > { %v499_v40 = vadd.f32 %v1978_v38, %v2468_v1  ;;  %2019 = vmatprep.mubr.bf16.mxu1 %v616_v35  ;;  %v551_v47 = vpop.f32.mrf.mxu1  ;;  %v590_v48 = vmax.f32 %v488_v39, 0.0  ;;  %2057 = vmatprep.subr.bf16.mxu0 %v2202_v41 }
  0xef   : > { %v490_v43 = vpop.f32.mrf.mxu0  ;;  %2020 = vmatmul.mubr.bf16.gmra.mxu1 %v617_v37  ;;  %v624_v22 = vpack.c.bf16 %v603_v18, %v602_v17  ;;  %v552_v24 = vadd.f32 %v2468_v1, %v551_v47  ;;  %v625_v37 = vpack.c.bf16 %v605_v31, %v604_v30  ;;  %2058 = vmatpush3.bf16.msra.mxu0 %v2202_v41 }
  0xf0   : > { %v491_v44 = vadd.f32 %v2468_v1, %v490_v43  ;;  %v593_v45 = vmax.f32 %v499_v40, 0.0  ;;  %v1994_v57 = vpop.f32.mrf.mxu1  ;;  %v608_v40 = vmax.f32 %v560_v23, 0.0 }
  0xf1   : > { %v1981_v46 = vpop.f32.mrf.mxu0  ;;  %v606_v28 = vmax.f32 %v552_v24, 0.0  ;;  %v563_v38 = vadd.f32 %v1994_v57, %v2468_v1 }
  0xf2   : > { %v591_v49 = vmax.f32 %v491_v44, 0.0  ;;  %v619_v55 = vpack.c.bf16 %v593_v45, %v592_v50  ;;  %v512_v60 = vadd.f32 %v1981_v46, %v2468_v1  ;;  %v554_v3 = vpop.f32.mrf.mxu1  ;;  %v2203_v50 = vld [vmem:[%s2759_s5 + $0x8] sm:$0xff]  }
  0xf3   : > { %v503_v51 = vpop.f32.mrf.mxu0  ;;  %v555_v25 = vadd.f32 %v2468_v1, %v554_v3  ;;  %v609_v42 = vmax.f32 %v563_v38, 0.0  ;;  %2059 = vmatprep.subr.bf16.mxu0 %v2203_v50 }
  0xf4   : > { %v618_v52 = vpack.c.bf16 %v591_v49, %v590_v48  ;;  %v504_v58 = vadd.f32 %v2468_v1, %v503_v51  ;;  %v596_v7 = vmax.f32 %v512_v60, 0.0  ;;  %v1997_v16 = vpop.f32.mrf.mxu1  ;;  %2060 = vmatpush3.bf16.msra.mxu0 %v2203_v50 }
  0xf5   : > { %v1982_v56 = vpop.f32.mrf.mxu0  ;;  %v607_v29 = vmax.f32 %v555_v25, 0.0  ;;  %v627_v44 = vpack.c.bf16 %v609_v42, %v608_v40  ;;  %v576_v45 = vadd.f32 %v1997_v16, %v2468_v1 }
  0xf6   : > { %v515_v59 = vadd.f32 %v1982_v56, %v2468_v1  ;;  %2023 = vmatprep.mubr.bf16.mxu1 %v618_v52  ;;  %v594_v4 = vmax.f32 %v504_v58, 0.0  ;;  %v567_v21 = vpop.f32.mrf.mxu1 }
  0xf7   : > { %v506_v61 = vpop.f32.mrf.mxu0  ;;  %2024 = vmatmul.mubr.bf16.gmra.mxu1 %v619_v55  ;;  %v626_v34 = vpack.c.bf16 %v607_v29, %v606_v28  ;;  %v568_v35 = vadd.f32 %v2468_v1, %v567_v21  ;;  %v612_v47 = vmax.f32 %v576_v45, 0.0 }
  0xf8   : > { %v507_v63 = vadd.f32 %v2468_v1, %v506_v61  ;;  %v597_v2 = vmax.f32 %v515_v59, 0.0  ;;  %v1998_v27 = vpop.f32.mrf.mxu1 }
  0xf9   : > { %v610_v32 = vmax.f32 %v568_v35, 0.0  ;;  %v579_v46 = vadd.f32 %v1998_v27, %v2468_v1 }
  0xfa   : > { %v595_v6 = vmax.f32 %v507_v63, 0.0  ;;  %v621_v13 = vpack.c.bf16 %v597_v2, %v596_v7  ;;  %v570_v33 = vpop.f32.mrf.mxu1 }
  0xfb   : > { %v571_v36 = vadd.f32 %v2468_v1, %v570_v33  ;;  %v613_v48 = vmax.f32 %v579_v46, 0.0  ;;  %v2204_v1 = vld [vmem:[%s2759_s5] sm:$0xff]  }
  0xfc   : > { %v620_v8 = vpack.c.bf16 %v595_v6, %v594_v4  ;;  %2061 = vmatprep.subr.bf16.mxu0 %v2204_v1 }
  0xfd   : > { %v611_v39 = vmax.f32 %v571_v36, 0.0  ;;  %v629_v49 = vpack.c.bf16 %v613_v48, %v612_v47  ;;  %2062 = vmatpush3.bf16.msra.mxu0 %v2204_v1 }
  0xfe   : > { %2027 = vmatprep.mubr.bf16.mxu1 %v620_v8 }
  0xff   : > { %2028 = vmatmul.mubr.bf16.gmra.mxu1 %v621_v13  ;;  %v628_v43 = vpack.c.bf16 %v611_v39, %v610_v32 }
 0x100   : > { %2031 = vmatprep.mubr.bf16.mxu1 %v622_v9 }
 0x107   : > { %2032 = vmatmul.mubr.bf16.gmra.mxu1 %v623_v26 }
 0x108   : > { %2035 = vmatprep.mubr.bf16.mxu1 %v624_v22 }
 0x10f   : > { %2036 = vmatmul.mubr.bf16.gmra.mxu1 %v625_v37 }
 0x110   : > { %2039 = vmatprep.mubr.bf16.mxu1 %v626_v34 }
 0x117   : > { %2040 = vmatmul.mubr.bf16.gmra.mxu1 %v627_v44 }
 0x118   : > { %2043 = vmatprep.mubr.bf16.mxu1 %v628_v43 }
 0x11f   : > { %2044 = vmatmul.mubr.bf16.gmra.mxu1 %v629_v49 }
 0x1a7   : > { %v2017_v51 = vpop.f32.mrf.mxu1 }
 0x1a8   : > { %v744_v57 = vadd.f32 %v2017_v51, %v2529_v53 }
 0x1a9   : > { %v735_v52 = vpop.f32.mrf.mxu1 }
 0x1aa   : > { %v736_v55 = vadd.f32 %v2529_v53, %v735_v52  ;;  %v864_v0 = vmax.f32 %v744_v57, 0.0 }
 0x1ab   : > { %v2018_v54 = vpop.f32.mrf.mxu1 }
 0x1ac   : > { %v747_v56 = vadd.f32 %v2018_v54, %v2529_v53  ;;  %v862_v62 = vmax.f32 %v736_v55, 0.0 }
 0x1ad   : > { %v738_v58 = vpop.f32.mrf.mxu1 }
 0x1ae   : > { %v739_v59 = vadd.f32 %v2529_v53, %v738_v58  ;;  %v865_v60 = vmax.f32 %v747_v56, 0.0 }
 0x1af   : > { %v2021_v61 = vpop.f32.mrf.mxu1 }
 0x1b0   : > { %v863_v63 = vmax.f32 %v739_v59, 0.0  ;;  %v895_v4 = vpack.c.bf16 %v865_v60, %v864_v0  ;;  %v760_v9 = vadd.f32 %v2021_v61, %v2529_v53 }
 0x1b1   : > { %v751_v2 = vpop.f32.mrf.mxu1 }
 0x1b2   : > { %v894_v3 = vpack.c.bf16 %v863_v63, %v862_v62  ;;  %v752_v7 = vadd.f32 %v2529_v53, %v751_v2  ;;  %v868_v17 = vmax.f32 %v760_v9, 0.0 }
 0x1b3   : > { %v2022_v6 = vpop.f32.mrf.mxu1 }
 0x1b4   : > { %v763_v8 = vadd.f32 %v2022_v6, %v2529_v53  ;;  %2063 = vmatprep.mubr.bf16.mxu0 %v894_v3  ;;  %v866_v15 = vmax.f32 %v752_v7, 0.0 }
 0x1b5   : > { %v754_v10 = vpop.f32.mrf.mxu1  ;;  %2064 = vmatmul.mubr.bf16.vlgmr.msra.gmra.mxu0 %v895_v4 }
 0x1b6   : > { %v755_v11 = vadd.f32 %v2529_v53, %v754_v10  ;;  %v869_v12 = vmax.f32 %v763_v8, 0.0 }
 0x1b7   : > { %v2025_v13 = vpop.f32.mrf.mxu1 }
 0x1b8   : > { %v867_v16 = vmax.f32 %v755_v11, 0.0  ;;  %v897_v20 = vpack.c.bf16 %v869_v12, %v868_v17  ;;  %v776_v25 = vadd.f32 %v2025_v13, %v2529_v53 }
 0x1b9   : > { %v767_v18 = vpop.f32.mrf.mxu1 }
 0x1ba   : > { %v896_v19 = vpack.c.bf16 %v867_v16, %v866_v15  ;;  %v768_v22 = vadd.f32 %v2529_v53, %v767_v18  ;;  %v872_v30 = vmax.f32 %v776_v25, 0.0 }
 0x1bb   : > { %v2026_v21 = vpop.f32.mrf.mxu1 }
 0x1bc   : > { %v779_v24 = vadd.f32 %v2026_v21, %v2529_v53  ;;  %2067 = vmatprep.mubr.bf16.mxu0 %v896_v19  ;;  %v870_v28 = vmax.f32 %v768_v22, 0.0 }
 0x1bd   : > { %v770_v26 = vpop.f32.mrf.mxu1  ;;  %2068 = vmatmul.mubr.bf16.gmra.mxu0 %v897_v20 }
 0x1be   : > { %v771_v5 = vadd.f32 %v2529_v53, %v770_v26  ;;  %v873_v14 = vmax.f32 %v779_v24, 0.0 }
 0x1bf   : > { %v2029_v27 = vpop.f32.mrf.mxu1 }
 0x1c0   : > { %v871_v29 = vmax.f32 %v771_v5, 0.0  ;;  %v899_v34 = vpack.c.bf16 %v873_v14, %v872_v30  ;;  %v792_v23 = vadd.f32 %v2029_v27, %v2529_v53 }
 0x1c1   : > { %v783_v31 = vpop.f32.mrf.mxu1 }
 0x1c2   : > { %v898_v33 = vpack.c.bf16 %v871_v29, %v870_v28  ;;  %v784_v36 = vadd.f32 %v2529_v53, %v783_v31  ;;  %v876_v44 = vmax.f32 %v792_v23, 0.0 }
 0x1c3   : > { %v2030_v35 = vpop.f32.mrf.mxu1 }
 0x1c4   : > { %v795_v37 = vadd.f32 %v2030_v35, %v2529_v53  ;;  %2071 = vmatprep.mubr.bf16.mxu0 %v898_v33  ;;  %v874_v42 = vmax.f32 %v784_v36, 0.0 }
 0x1c5   : > { %v786_v38 = vpop.f32.mrf.mxu1  ;;  %2072 = vmatmul.mubr.bf16.gmra.mxu0 %v899_v34 }
 0x1c6   : > { %v787_v32 = vadd.f32 %v2529_v53, %v786_v38  ;;  %v877_v39 = vmax.f32 %v795_v37, 0.0 }
 0x1c7   : > { %v2033_v40 = vpop.f32.mrf.mxu1 }
 0x1c8   : > { %v875_v43 = vmax.f32 %v787_v32, 0.0  ;;  %v901_v47 = vpack.c.bf16 %v877_v39, %v876_v44  ;;  %v808_v50 = vadd.f32 %v2033_v40, %v2529_v53  ;;  %v2566_v39 = vld [vmem:[%s2760_s6] ss:$0 sm:$0xff] }
 0x1c9   : > { %v799_v45 = vpop.f32.mrf.mxu1 }
 0x1ca   : > { %v900_v46 = vpack.c.bf16 %v875_v43, %v874_v42  ;;  %v800_v49 = vadd.f32 %v2529_v53, %v799_v45  ;;  %v880_v57 = vmax.f32 %v808_v50, 0.0 }
 0x1cb   : > { %v2034_v48 = vpop.f32.mrf.mxu1 }
 0x1cc   : > { %v811_v41 = vadd.f32 %v2034_v48, %v2529_v53  ;;  %2075 = vmatprep.mubr.bf16.mxu0 %v900_v46  ;;  %v878_v55 = vmax.f32 %v800_v49, 0.0 }
 0x1cd   : > { %v802_v1 = vpop.f32.mrf.mxu1  ;;  %2076 = vmatmul.mubr.bf16.gmra.mxu0 %v901_v47 }
 0x1ce   : > { %v803_v51 = vadd.f32 %v2529_v53, %v802_v1  ;;  %v881_v52 = vmax.f32 %v811_v41, 0.0 }
 0x1cf   : > { %v2037_v54 = vpop.f32.mrf.mxu1 }
 0x1d0   : > { %v879_v56 = vmax.f32 %v803_v51, 0.0  ;;  %v903_v60 = vpack.c.bf16 %v881_v52, %v880_v57  ;;  %v824_v0 = vadd.f32 %v2037_v54, %v2529_v53 }
 0x1d1   : > { %v815_v58 = vpop.f32.mrf.mxu1 }
 0x1d2   : > { %v902_v59 = vpack.c.bf16 %v879_v56, %v878_v55  ;;  %v816_v62 = vadd.f32 %v2529_v53, %v815_v58  ;;  %v884_v9 = vmax.f32 %v824_v0, 0.0 }
 0x1d3   : > { %v2038_v61 = vpop.f32.mrf.mxu1 }
 0x1d4   : > { %v827_v63 = vadd.f32 %v2038_v61, %v2529_v53  ;;  %2079 = vmatprep.mubr.bf16.mxu0 %v902_v59  ;;  %v882_v7 = vmax.f32 %v816_v62, 0.0 }
 0x1d5   : > { %v818_v2 = vpop.f32.mrf.mxu1  ;;  %2080 = vmatmul.mubr.bf16.gmra.mxu0 %v903_v60 }
 0x1d6   : > { %v819_v3 = vadd.f32 %v2529_v53, %v818_v2  ;;  %v885_v4 = vmax.f32 %v827_v63, 0.0 }
 0x1d7   : > { %v2041_v6 = vpop.f32.mrf.mxu1 }
 0x1d8   : > { %v883_v8 = vmax.f32 %v819_v3, 0.0  ;;  %v905_v12 = vpack.c.bf16 %v885_v4, %v884_v9  ;;  %v840_v17 = vadd.f32 %v2041_v6, %v2529_v53 }
 0x1d9   : > { %v831_v10 = vpop.f32.mrf.mxu1 }
 0x1da   : > { %v904_v11 = vpack.c.bf16 %v883_v8, %v882_v7  ;;  %v832_v15 = vadd.f32 %v2529_v53, %v831_v10  ;;  %v888_v25 = vmax.f32 %v840_v17, 0.0 }
 0x1db   : > { %v2042_v13 = vpop.f32.mrf.mxu1 }
 0x1dc   : > { %v843_v16 = vadd.f32 %v2042_v13, %v2529_v53  ;;  %2083 = vmatprep.mubr.bf16.mxu0 %v904_v11  ;;  %v886_v22 = vmax.f32 %v832_v15, 0.0 }
 0x1dd   : > { %v834_v18 = vpop.f32.mrf.mxu1  ;;  %2084 = vmatmul.mubr.bf16.gmra.mxu0 %v905_v12 }
 0x1de   : > { %v835_v19 = vadd.f32 %v2529_v53, %v834_v18  ;;  %v889_v20 = vmax.f32 %v843_v16, 0.0 }
 0x1df   : > { %v2045_v21 = vpop.f32.mrf.mxu1 }
 0x1e0   : > { %v887_v24 = vmax.f32 %v835_v19, 0.0  ;;  %v907_v14 = vpack.c.bf16 %v889_v20, %v888_v25  ;;  %v856_v30 = vadd.f32 %v2045_v21, %v2529_v53 }
 0x1e1   : > { %v847_v26 = vpop.f32.mrf.mxu1 }
 0x1e2   : > { %v906_v5 = vpack.c.bf16 %v887_v24, %v886_v22  ;;  %v848_v28 = vadd.f32 %v2529_v53, %v847_v26  ;;  %v892_v37 = vmax.f32 %v856_v30, 0.0 }
 0x1e3   : > { %v2046_v27 = vpop.f32.mrf.mxu1 }
 0x1e4   : > { %v859_v29 = vadd.f32 %v2046_v27, %v2529_v53  ;;  %2087 = vmatprep.mubr.bf16.mxu0 %v906_v5  ;;  %v890_v35 = vmax.f32 %v848_v28, 0.0 }
 0x1e5   : > { %v850_v31 = vpop.f32.mrf.mxu1  ;;  %2088 = vmatmul.mubr.bf16.gmra.mxu0 %v907_v14 }
 0x1e6   : > { %v851_v33 = vadd.f32 %v2529_v53, %v850_v31  ;;  %v893_v34 = vmax.f32 %v859_v29, 0.0 }
 0x1e8   : > { %v891_v36 = vmax.f32 %v851_v33, 0.0  ;;  %v909_v38 = vpack.c.bf16 %v893_v34, %v892_v37 }
 0x1ea   : > { %v908_v23 = vpack.c.bf16 %v891_v36, %v890_v35 }
 0x1ec   : > { %2091 = vmatprep.mubr.bf16.mxu0 %v908_v23 }
 0x1ed   : > { %2092 = vmatmul.mubr.bf16.gmra.mxu0 %v909_v38 }
 0x275   : > { %v2065_v32 = vpop.f32.mrf.mxu0 }
 0x276   : > { %v1024_v42 = vadd.f32 %v2065_v32, %v2566_v39 }
 0x277   : > { %v1015_v40 = vpop.f32.mrf.mxu0 }
 0x278   : > { %v1016_v53 = vadd.f32 %v2566_v39, %v1015_v40  ;;  %v1144_v46 = vmax.f32 %v1024_v42, 0.0 }
 0x279   : > { %v2066_v43 = vpop.f32.mrf.mxu0 }
 0x27a   : > { %v1027_v44 = vadd.f32 %v2066_v43, %v2566_v39  ;;  %v1142_v41 = vmax.f32 %v1016_v53, 0.0 }
 0x27b   : > { %v1018_v45 = vpop.f32.mrf.mxu0 }
 0x27c   : > { %v1145_v47 = vmax.f32 %v1027_v44, 0.0  ;;  %v1019_v48 = vadd.f32 %v2566_v39, %v1018_v45 }
 0x27d   : > { %v2069_v49 = vpop.f32.mrf.mxu0 }
 0x27e   : > { %v1810_v50 = vpack.c.bf16 %v1145_v47, %v1144_v46  ;;  %v1143_v1 = vmax.f32 %v1019_v48, 0.0  ;;  %v1040_v54 = vadd.f32 %v2069_v49, %v2566_v39 }
 0x27f   : > { %v1031_v51 = vpop.f32.mrf.mxu0 }
 0x280   : > { %1882 = vst [vmem:[%s2573_s11 + $0x8] sm:$0xff] %v1810_v50   ;;  %v1805_v52 = vpack.c.bf16 %v1143_v1, %v1142_v41  ;;  %v1032_v56 = vadd.f32 %v2566_v39, %v1031_v51  ;;  %v1148_v59 = vmax.f32 %v1040_v54, 0.0 }
 0x281   : > { %v2070_v55 = vpop.f32.mrf.mxu0 }
 0x282   : > { %1806 = vst [vmem:[%s2573_s11] sm:$0xff] %v1805_v52   ;;  %v1043_v57 = vadd.f32 %v2070_v55, %v2566_v39  ;;  %v1146_v63 = vmax.f32 %v1032_v56, 0.0 }
 0x283   : > { %v1034_v58 = vpop.f32.mrf.mxu0 }
 0x284   : > { %v1149_v60 = vmax.f32 %v1043_v57, 0.0  ;;  %v1035_v61 = vadd.f32 %v2566_v39, %v1034_v58 }
 0x285   : > { %v2073_v62 = vpop.f32.mrf.mxu0 }
 0x286   : > { %v1820_v0 = vpack.c.bf16 %v1149_v60, %v1148_v59  ;;  %v1147_v2 = vmax.f32 %v1035_v61, 0.0  ;;  %v1056_v6 = vadd.f32 %v2073_v62, %v2566_v39 }
 0x287   : > { %v1047_v3 = vpop.f32.mrf.mxu0 }
 0x288   : > { %1884 = vst [vmem:[%s2573_s11 + $0x18] sm:$0xff] %v1820_v0   ;;  %v1815_v4 = vpack.c.bf16 %v1147_v2, %v1146_v63  ;;  %v1048_v8 = vadd.f32 %v2566_v39, %v1047_v3  ;;  %v1152_v11 = vmax.f32 %v1056_v6, 0.0 }
 0x289   : > { %v2074_v7 = vpop.f32.mrf.mxu0 }
 0x28a   : > { %1883 = vst [vmem:[%s2573_s11 + $0x10] sm:$0xff] %v1815_v4   ;;  %v1059_v9 = vadd.f32 %v2074_v7, %v2566_v39  ;;  %v1150_v16 = vmax.f32 %v1048_v8, 0.0 }
 0x28b   : > { %v1050_v10 = vpop.f32.mrf.mxu0 }
 0x28c   : > { %v1153_v12 = vmax.f32 %v1059_v9, 0.0  ;;  %v1051_v13 = vadd.f32 %v2566_v39, %v1050_v10 }
 0x28d   : > { %v2077_v15 = vpop.f32.mrf.mxu0 }
 0x28e   : > { %v1830_v17 = vpack.c.bf16 %v1153_v12, %v1152_v11  ;;  %v1151_v18 = vmax.f32 %v1051_v13, 0.0  ;;  %v1072_v21 = vadd.f32 %v2077_v15, %v2566_v39 }
 0x28f   : > { %v1063_v19 = vpop.f32.mrf.mxu0 }
 0x290   : > { %1886 = vst [vmem:[%s2573_s11 + $0x28] sm:$0xff] %v1830_v17   ;;  %v1825_v20 = vpack.c.bf16 %v1151_v18, %v1150_v16  ;;  %v1064_v24 = vadd.f32 %v2566_v39, %v1063_v19  ;;  %v1156_v5 = vmax.f32 %v1072_v21, 0.0 }
 0x291   : > { %v2078_v22 = vpop.f32.mrf.mxu0 }
 0x292   : > { %1885 = vst [vmem:[%s2573_s11 + $0x20] sm:$0xff] %v1825_v20   ;;  %v1075_v25 = vadd.f32 %v2078_v22, %v2566_v39  ;;  %v1154_v29 = vmax.f32 %v1064_v24, 0.0 }
 0x293   : > { %v1066_v26 = vpop.f32.mrf.mxu0 }
 0x294   : > { %v1157_v14 = vmax.f32 %v1075_v25, 0.0  ;;  %v1067_v27 = vadd.f32 %v2566_v39, %v1066_v26 }
 0x295   : > { %v2081_v28 = vpop.f32.mrf.mxu0 }
 0x296   : > { %v1840_v30 = vpack.c.bf16 %v1157_v14, %v1156_v5  ;;  %v1155_v31 = vmax.f32 %v1067_v27, 0.0  ;;  %v1088_v35 = vadd.f32 %v2081_v28, %v2566_v39 }
 0x297   : > { %v1079_v33 = vpop.f32.mrf.mxu0 }
 0x298   : > { %1888 = vst [vmem:[%s2573_s11 + $0x38] sm:$0xff] %v1840_v30   ;;  %v1835_v34 = vpack.c.bf16 %v1155_v31, %v1154_v29  ;;  %v1080_v37 = vadd.f32 %v2566_v39, %v1079_v33  ;;  %v1160_v32 = vmax.f32 %v1088_v35, 0.0 }
 0x299   : > { %v2082_v36 = vpop.f32.mrf.mxu0 }
 0x29a   : > { %1887 = vst [vmem:[%s2573_s11 + $0x30] sm:$0xff] %v1835_v34   ;;  %v1091_v23 = vadd.f32 %v2082_v36, %v2566_v39  ;;  %v1158_v53 = vmax.f32 %v1080_v37, 0.0 }
 0x29b   : > { %v1082_v38 = vpop.f32.mrf.mxu0 }
 0x29c   : > { %v1161_v40 = vmax.f32 %v1091_v23, 0.0  ;;  %v1083_v42 = vadd.f32 %v2566_v39, %v1082_v38 }
 0x29d   : > { %v2085_v43 = vpop.f32.mrf.mxu0 }
 0x29e   : > { %v1850_v44 = vpack.c.bf16 %v1161_v40, %v1160_v32  ;;  %v1159_v45 = vmax.f32 %v1083_v42, 0.0  ;;  %v1104_v48 = vadd.f32 %v2085_v43, %v2566_v39 }
 0x29f   : > { %v1095_v46 = vpop.f32.mrf.mxu0 }
 0x2a0   : > { %1890 = vst [vmem:[%s2573_s11 + $0x48] sm:$0xff] %v1850_v44   ;;  %v1845_v47 = vpack.c.bf16 %v1159_v45, %v1158_v53  ;;  %v1096_v41 = vadd.f32 %v2566_v39, %v1095_v46  ;;  %v1164_v51 = vmax.f32 %v1104_v48, 0.0 }
 0x2a1   : > { %v2086_v49 = vpop.f32.mrf.mxu0 }
 0x2a2   : > { %1889 = vst [vmem:[%s2573_s11 + $0x40] sm:$0xff] %v1845_v47   ;;  %v1107_v50 = vadd.f32 %v2086_v49, %v2566_v39  ;;  %v1162_v56 = vmax.f32 %v1096_v41, 0.0 }
 0x2a3   : > { %v1098_v1 = vpop.f32.mrf.mxu0 }
 0x2a4   : > { %v1165_v52 = vmax.f32 %v1107_v50, 0.0  ;;  %v1099_v54 = vadd.f32 %v2566_v39, %v1098_v1 }
 0x2a5   : > { %v2089_v55 = vpop.f32.mrf.mxu0 }
 0x2a6   : > { %v1860_v57 = vpack.c.bf16 %v1165_v52, %v1164_v51  ;;  %v1163_v58 = vmax.f32 %v1099_v54, 0.0  ;;  %v1120_v61 = vadd.f32 %v2089_v55, %v2566_v39 }
 0x2a7   : > { %v1111_v59 = vpop.f32.mrf.mxu0 }
 0x2a8   : > { %1892 = vst [vmem:[%s2573_s11 + $0x58] sm:$0xff] %v1860_v57   ;;  %v1855_v60 = vpack.c.bf16 %v1163_v58, %v1162_v56  ;;  %v1112_v63 = vadd.f32 %v2566_v39, %v1111_v59  ;;  %v1168_v3 = vmax.f32 %v1120_v61, 0.0 }
 0x2a9   : > { %v2090_v62 = vpop.f32.mrf.mxu0 }
 0x2aa   : > { %1891 = vst [vmem:[%s2573_s11 + $0x50] sm:$0xff] %v1855_v60   ;;  %v1123_v0 = vadd.f32 %v2090_v62, %v2566_v39  ;;  %v1166_v8 = vmax.f32 %v1112_v63, 0.0 }
 0x2ab   : > { %v1114_v2 = vpop.f32.mrf.mxu0 }
 0x2ac   : > { %v1169_v4 = vmax.f32 %v1123_v0, 0.0  ;;  %v1115_v6 = vadd.f32 %v2566_v39, %v1114_v2 }
 0x2ad   : > { %v2093_v7 = vpop.f32.mrf.mxu0 }
 0x2ae   : > { %v1870_v9 = vpack.c.bf16 %v1169_v4, %v1168_v3  ;;  %v1167_v10 = vmax.f32 %v1115_v6, 0.0  ;;  %v1136_v13 = vadd.f32 %v2093_v7, %v2566_v39 }
 0x2af   : > { %v1127_v11 = vpop.f32.mrf.mxu0 }
 0x2b0   : > { %1894 = vst [vmem:[%s2573_s11 + $0x68] sm:$0xff] %v1870_v9   ;;  %v1865_v12 = vpack.c.bf16 %v1167_v10, %v1166_v8  ;;  %v1128_v16 = vadd.f32 %v2566_v39, %v1127_v11  ;;  %v1172_v19 = vmax.f32 %v1136_v13, 0.0 }
 0x2b1   : > { %v2094_v15 = vpop.f32.mrf.mxu0 }
 0x2b2   : > { %1893 = vst [vmem:[%s2573_s11 + $0x60] sm:$0xff] %v1865_v12   ;;  %v1139_v17 = vadd.f32 %v2094_v15, %v2566_v39  ;;  %v1170_v22 = vmax.f32 %v1128_v16, 0.0 }
 0x2b3   : > { %v1130_v18 = vpop.f32.mrf.mxu0 }
 0x2b4   : > { %v1173_v20 = vmax.f32 %v1139_v17, 0.0  ;;  %v1131_v21 = vadd.f32 %v2566_v39, %v1130_v18 }
 0x2b6   : > { %v1880_v24 = vpack.c.bf16 %v1173_v20, %v1172_v19  ;;  %v1171_v25 = vmax.f32 %v1131_v21, 0.0  ;;  %1340 = sbr.rel (!%p2358_p4) target bundleno = 759 (0x2f7), region = 52 }
 0x2b8   : > { %1896 = vst [vmem:[%s2573_s11 + $0x78] sm:$0xff] %v1880_v24   ;;  %v1875_v26 = vpack.c.bf16 %v1171_v25, %v1170_v22 }
 0x2ba   : > { %1895 = vst [vmem:[%s2573_s11 + $0x70] sm:$0xff] %v1875_v26  }
 0x2bb   : > { %s2770_s24 = smov (!%p1343_p8, %s1342_s24), 32 }
 0x2bc   : > { %s1752_s17 = sshll.u32 %s2770_s24, 6 }
 0x2bd   : > { %p1755_p9 = scmp.eq.s32.totalorder %s1752_s17, 0 }
 0x2be   : > { %s2632_s18 = sshrl.u32 (!%p1755_p9), %s2770_s24, 5 }
 0x2bf   : > { %1351 = sbr.rel (%p1755_p9) target bundleno = 759 (0x2f7), region = 56  ;;  %p1756_p10 = scmp.le.s32.totalorder (!%p1755_p9), %s2632_s18, 0 }
 0x2c4   : > { %1630 = sbr.rel (%p1756_p10) target bundleno = 742 (0x2e6), region = 128  ;;  %s2763_s27 = smov (!%p1756_p10), %s2626_s16 }
 0x2c5   : > { %s2764_s9 = smov (!%p1756_p10), %s2573_s11  ;;  %s2641_s12 = smov (!%p1756_p10), 0  }
 0x2c6   : > { %s2643_s19 = smov (!%p1756_p10), 0  }
 0x2c9 LB: >> { %v1368_v39 = vld [vmem:[%s2267_s9] sm:$0xf]  ;;  %v1370_v5 = vld [vmem:[%s2267_s9 + $0x4] sm:$0xf]  ;;  %v1372_v14 = vld [vmem:[%s2267_s9 + $0x8] sm:$0xf]  ;;  %s2275_s19 = sphi %s2643_s19, %s1362_s19   ;;  %s2271_s12 = sphi %s2641_s12, %s2765_s12   ;;  %s2267_s9 = sphi %s2764_s9, %s1437_s9   ;;  %s2263_s27 = sphi %s2763_s27, %s1438_s27  }
 0x2ca   : >> { %1369 = vst [vmem:[%s2263_s27] sm:$0xf] %v1368_v39  ;;  %1371 = vst [vmem:[%s2263_s27 + $0x4] sm:$0xf] %v1370_v5  ;;  %v1374_v27 = vld [vmem:[%s2267_s9 + $0xc] sm:$0xf]  ;;  %s1432_s20 = sadd.s32 1, %s2271_s12 }
 0x2cb   : >> { %1373 = vst [vmem:[%s2263_s27 + $0x8] sm:$0xf] %v1372_v14  ;;  %v1376_v28 = vld [vmem:[%s2267_s9 + $0x10] sm:$0xf]  ;;  %v1378_v29 = vld [vmem:[%s2267_s9 + $0x14] sm:$0xf]  ;;  %p1433_p11 = scmp.ge.s32.totalorder %s1432_s20, %s2632_s18 }
 0x2cc   : >> { %1375 = vst [vmem:[%s2263_s27 + $0xc] sm:$0xf] %v1374_v27  ;;  %1377 = vst [vmem:[%s2263_s27 + $0x10] sm:$0xf] %v1376_v28  ;;  %v1380_v30 = vld [vmem:[%s2267_s9 + $0x18] sm:$0xf] }
 0x2cd   : >> { %1379 = vst [vmem:[%s2263_s27 + $0x14] sm:$0xf] %v1378_v29  ;;  %v1382_v31 = vld [vmem:[%s2267_s9 + $0x1c] sm:$0xf]  ;;  %v1384_v33 = vld [vmem:[%s2267_s9 + $0x20] sm:$0xf] }
 0x2ce   : >> { %1381 = vst [vmem:[%s2263_s27 + $0x18] sm:$0xf] %v1380_v30  ;;  %1383 = vst [vmem:[%s2263_s27 + $0x1c] sm:$0xf] %v1382_v31  ;;  %v1386_v34 = vld [vmem:[%s2267_s9 + $0x24] sm:$0xf] }
 0x2cf   : >> { %1385 = vst [vmem:[%s2263_s27 + $0x20] sm:$0xf] %v1384_v33  ;;  %v1388_v35 = vld [vmem:[%s2267_s9 + $0x28] sm:$0xf]  ;;  %v1390_v36 = vld [vmem:[%s2267_s9 + $0x2c] sm:$0xf] }
 0x2d0   : >> { %1387 = vst [vmem:[%s2263_s27 + $0x24] sm:$0xf] %v1386_v34  ;;  %1389 = vst [vmem:[%s2263_s27 + $0x28] sm:$0xf] %v1388_v35  ;;  %v1392_v37 = vld [vmem:[%s2267_s9 + $0x30] sm:$0xf] }
 0x2d1   : >> { %1391 = vst [vmem:[%s2263_s27 + $0x2c] sm:$0xf] %v1390_v36  ;;  %v1394_v23 = vld [vmem:[%s2267_s9 + $0x34] sm:$0xf]  ;;  %v1396_v38 = vld [vmem:[%s2267_s9 + $0x38] sm:$0xf] }
 0x2d2   : >> { %1393 = vst [vmem:[%s2263_s27 + $0x30] sm:$0xf] %v1392_v37  ;;  %1395 = vst [vmem:[%s2263_s27 + $0x34] sm:$0xf] %v1394_v23  ;;  %v1398_v32 = vld [vmem:[%s2267_s9 + $0x3c] sm:$0xf] }
 0x2d3   : >> { %1397 = vst [vmem:[%s2263_s27 + $0x38] sm:$0xf] %v1396_v38  ;;  %v1400_v40 = vld [vmem:[%s2267_s9 + $0x40] sm:$0xf]  ;;  %v1402_v42 = vld [vmem:[%s2267_s9 + $0x44] sm:$0xf] }
 0x2d4   : >> { %1399 = vst [vmem:[%s2263_s27 + $0x3c] sm:$0xf] %v1398_v32  ;;  %1401 = vst [vmem:[%s2263_s27 + $0x40] sm:$0xf] %v1400_v40  ;;  %v1404_v43 = vld [vmem:[%s2267_s9 + $0x48] sm:$0xf] }
 0x2d5   : >> { %1403 = vst [vmem:[%s2263_s27 + $0x44] sm:$0xf] %v1402_v42  ;;  %v1406_v53 = vld [vmem:[%s2267_s9 + $0x4c] sm:$0xf]  ;;  %v1408_v44 = vld [vmem:[%s2267_s9 + $0x50] sm:$0xf] }
 0x2d6   : >> { %1405 = vst [vmem:[%s2263_s27 + $0x48] sm:$0xf] %v1404_v43  ;;  %1407 = vst [vmem:[%s2263_s27 + $0x4c] sm:$0xf] %v1406_v53  ;;  %v1410_v45 = vld [vmem:[%s2267_s9 + $0x54] sm:$0xf] }
 0x2d7   : >> { %1409 = vst [vmem:[%s2263_s27 + $0x50] sm:$0xf] %v1408_v44  ;;  %v1412_v46 = vld [vmem:[%s2267_s9 + $0x58] sm:$0xf]  ;;  %v1414_v47 = vld [vmem:[%s2267_s9 + $0x5c] sm:$0xf] }
 0x2d8   : >> { %1411 = vst [vmem:[%s2263_s27 + $0x54] sm:$0xf] %v1410_v45  ;;  %1413 = vst [vmem:[%s2263_s27 + $0x58] sm:$0xf] %v1412_v46  ;;  %v1416_v48 = vld [vmem:[%s2267_s9 + $0x60] sm:$0xf] }
 0x2d9   : >> { %1415 = vst [vmem:[%s2263_s27 + $0x5c] sm:$0xf] %v1414_v47  ;;  %v1418_v49 = vld [vmem:[%s2267_s9 + $0x64] sm:$0xf]  ;;  %v1420_v41 = vld [vmem:[%s2267_s9 + $0x68] sm:$0xf] }
 0x2da   : >> { %1417 = vst [vmem:[%s2263_s27 + $0x60] sm:$0xf] %v1416_v48  ;;  %1419 = vst [vmem:[%s2263_s27 + $0x64] sm:$0xf] %v1418_v49  ;;  %v1422_v50 = vld [vmem:[%s2267_s9 + $0x6c] sm:$0xf] }
 0x2db   : >> { %1421 = vst [vmem:[%s2263_s27 + $0x68] sm:$0xf] %v1420_v41  ;;  %v1424_v1 = vld [vmem:[%s2267_s9 + $0x70] sm:$0xf]  ;;  %v1426_v51 = vld [vmem:[%s2267_s9 + $0x74] sm:$0xf] }
 0x2dc   : >> { %1423 = vst [vmem:[%s2263_s27 + $0x6c] sm:$0xf] %v1422_v50  ;;  %1425 = vst [vmem:[%s2263_s27 + $0x70] sm:$0xf] %v1424_v1  ;;  %v1428_v52 = vld [vmem:[%s2267_s9 + $0x78] sm:$0xf] }
 0x2dd   : >> { %1427 = vst [vmem:[%s2263_s27 + $0x74] sm:$0xf] %v1426_v51  ;;  %v1430_v54 = vld [vmem:[%s2267_s9 + $0x7c] sm:$0xf]  ;;  %1429 = vst [vmem:[%s2263_s27 + $0x78] sm:$0xf] %v1428_v52 }
 0x2de   : >> { %1431 = vst [vmem:[%s2263_s27 + $0x7c] sm:$0xf] %v1430_v54  ;;  %s2772_s20 = smov (%p1433_p11, %s1432_s20), 0  ;;  %s1362_s19 = sadd.s32 1, %s2275_s19  }
 0x2df   : >> { %s1757_s21 = sshll.u32 %s2772_s20, 7  ;;  %p1361_p12 = scmp.ge.s32.totalorder %s1362_s19, %s2632_s18 }
 0x2e0   : >> { %s1437_s9 = scalar_lea.vmem %s2573_s11, %s1757_s21 [#allocation2]   ;;  %s1438_s27 = scalar_lea.vmem %s2626_s16, %s1757_s21  }
 0x2e1   : >> { %s2765_s12 = smov %s2772_s20  ;;  %1364 = sbr.rel (!%p1361_p12) target bundleno = 713 (0x2c9), region = 134 }
 0x2e6 PF: > { %s2736_s22 = sand.u32 31, %s2770_s24   ;;  %s1800_s23 = sshll.u32 %s2632_s18, 7 }
 0x2e7   : > { %s1443_s26 = scalar_lea.vmem %s2573_s11, %s1800_s23 [#allocation2]   ;;  %s1445_s29 = scalar_lea.vmem %s2626_s16, %s1800_s23  }
 0x2e8   : > { %p1762_p13 = scmp.le.s32.totalorder %s2736_s22, 0 }
 0x2e9   : > { %s2277_s30 = smov (!%p1762_p13), %s1445_s29   ;;  %s2281_s10 = smov (!%p1762_p13), %s1443_s26  }
 0x2ea   : > { %1644 = sbr.rel (%p1762_p13) target bundleno = 759 (0x2f7), region = 139  ;;  %s2285_s13 = smov (!%p1762_p13), 0  }
 0x2eb   : > { %s2289_s14 = smov (!%p1762_p13), 0  }
 0x2ef LB: >> { %v1455_v55 = vld [vmem:[%s2283_s10] sm:$0xf]  ;;  %s1457_s24 = sadd.s32 1, %s2287_s13  ;;  %s1449_s14 = sadd.s32 1, %s2291_s14   ;;  %s2291_s14 = sphi %s2289_s14, %s1449_s14   ;;  %s2287_s13 = sphi %s2285_s13, %s2286_s13   ;;  %s2283_s10 = sphi %s2281_s10, %s1462_s10   ;;  %s2279_s30 = sphi %s2277_s30, %s1463_s30  }
 0x2f0   : >> { %1456 = vst [vmem:[%s2279_s30] sm:$0xf] %v1455_v55  ;;  %p1458_p0 = scmp.ge.s32.totalorder %s1457_s24, %s2736_s22  ;;  %p1448_p1 = scmp.ge.s32.totalorder %s1449_s14, %s2736_s22 }
 0x2f2   : >> { %s2774_s24 = smov (%p1458_p0, %s1457_s24), 0  ;;  %1451 = sbr.rel (!%p1448_p1) target bundleno = 751 (0x2ef), region = 145 }
 0x2f3   : >> { %s1763_s11 = sshll.u32 %s2774_s24, 2  ;;  %s2286_s13 = smov %s2774_s24  }
 0x2f4   : >> { %s1462_s10 = scalar_lea.vmem %s1443_s26, %s1763_s11 [#allocation2]   ;;  %s1463_s30 = scalar_lea.vmem %s1445_s29, %s1763_s11  }
 0x2f7 PF: > { %p14_p2 = scmp.ge.s32.totalorder %s2348_s28, 4   ;;  %s2766_s24 = smov %s2255_s25 }
 0x2f8   : > { %s2767_s25 = smov %s2356_s8  ;;  %s2768_s26 = smov %s2348_s28 }
 0x2f9   :  { %16 = sbr.rel (!%p14_p2) target bundleno = 2 (0x2), region = 156 }

</bundles_post_ra>
